<compile_context>
chip_gen: v7x
topology: tpu7x:2x2x1
jax: 0.10.0
libtpu: 0.0.40
codegen_flags: <defaults>
</compile_context>

<pallas_src>
import functools

import jax
import jax.numpy as jnp
import numpy as np
from jax import lax
from jax.experimental import pallas as pl
from jax.experimental.pallas import tpu as pltpu

_TILE_CANDIDATES = (2048, 1024, 512, 256, 128, 64, 32, 16, 8)
_VMEM_SELECT_BUDGET = 28 * 1024 * 1024   # selection budget; enforced limit is explicit below
_VMEM_LIMIT_FLOOR = 32 * 1024 * 1024     # == v7x scoped default; < physical VMEM on every gen
_VMEM_LIMIT_CAP = 48 * 1024 * 1024       # stays well under v7x's 64 MiB physical VMEM


def _round_up(x, m):
    return ((x + m - 1) // m) * m


def _vmem_bytes(tm, D, H, io_bytes, w_bytes):
    """Conservative per-grid-step VMEM footprint."""
    Dp = _round_up(D, 128)
    Hp = _round_up(H, 128)
    io = 2 * tm * Dp * io_bytes * 2                # x tile + out tile, double-buffered
    weights = 2 * (D * Hp + H * Dp) * w_bytes      # const-index blocks are still double-buffered
    biases = 2 * (8 * Hp + 8 * Dp) * 4             # (1,H)/(1,D) blocks pad to 8 sublanes
    hidden = 4 * tm * Hp * 4                       # (tm,H) f32 hidden + erf/GELU temporaries
    casts = tm * (Dp + Hp) * 4                     # potential dtype-cast copies of x / h
    return io + weights + biases + hidden + casts


def _pick_row_tile(M, D, H, io_bytes, w_bytes):
    """Largest row tile that fits the VMEM budget.

    Never shrinks to tiny exact-divisor tiles; if the whole (sublane-rounded) row
    count is <= the largest candidate and fits, take it in a single grid step.
    """
    sub = 16 if io_bytes == 2 else 8               # bf16 rows pack in sublane pairs
    cap = _round_up(max(M, sub), sub)
    candidates = tuple(t for t in _TILE_CANDIDATES if t <= cap)
    if cap <= _TILE_CANDIDATES[0]:
        candidates = (cap,) + candidates           # whole problem in one step if it fits
    for t in candidates:
        if _vmem_bytes(t, D, H, io_bytes, w_bytes) <= _VMEM_SELECT_BUDGET:
            return max(t, sub)
    return sub


def _adapter_kernel(x_ref, w1_ref, b1_ref, w2_ref, b2_ref, o_ref, *, skip_connect):
    x = x_ref[...]
    # fc1 on the MXU; operands in the weights' dtype (f32 for f32 I/O), f32 accumulation.
    h = jnp.dot(x.astype(w1_ref.dtype), w1_ref[...],
                preferred_element_type=jnp.float32)
    h = h + b1_ref[...]
    # exact erf-based GELU (torch.nn.GELU default); stays entirely in VMEM.
    h = 0.5 * h * (1.0 + lax.erf(h * jnp.float32(0.7071067811865476)))
    # fc2 on the MXU; the (tm, H) hidden activation never leaves VMEM.
    y = jnp.dot(h.astype(w2_ref.dtype), w2_ref[...],
                preferred_element_type=jnp.float32)
    y = y + b2_ref[...]
    if skip_connect:
        y = y + x.astype(jnp.float32)
    o_ref[...] = y.astype(o_ref.dtype)


def adapter_forward(x, fc1_w, fc1_b, fc2_w, fc2_b, *, skip_connect=True):
    """Adapter forward. x: (..., D). fc1_w: (D, H), fc2_w: (H, D)
    (already transposed relative to PyTorch nn.Linear's (out, in) weight layout)."""
    orig_shape = x.shape
    D = orig_shape[-1]
    H = fc1_w.shape[1]
    x2 = x.reshape(-1, D)
    M = x2.shape[0]

    # f32 I/O -> f32 matmul operands (accuracy, no wall-clock cost when HBM-bound);
    # bf16 I/O -> native bf16 end-to-end (halves the x/out HBM traffic).
    compute_dtype = jnp.bfloat16 if x.dtype == jnp.bfloat16 else jnp.float32
    io_bytes = np.dtype(x.dtype).itemsize
    w_bytes = np.dtype(compute_dtype).itemsize

    tm = _pick_row_tile(M, D, H, io_bytes, w_bytes)
    grid = (pl.cdiv(M, tm),)   # ragged tail handled by Pallas partial-block masking

    w1 = fc1_w.astype(compute_dtype)
    w2 = fc2_w.astype(compute_dtype)
    b1 = fc1_b.reshape(1, H).astype(jnp.float32)
    b2 = fc2_b.reshape(1, D).astype(jnp.float32)

    vmem_limit = int(min(
        max(_VMEM_LIMIT_FLOOR,
            _vmem_bytes(tm, D, H, io_bytes, w_bytes) * 5 // 4 + (2 << 20)),
        _VMEM_LIMIT_CAP))

    kernel = functools.partial(_adapter_kernel, skip_connect=skip_connect)

    out = pl.pallas_call(
        kernel,
        out_shape=jax.ShapeDtypeStruct((M, D), x.dtype),
        grid=grid,
        in_specs=[
            pl.BlockSpec((tm, D), lambda i: (i, 0)),   # x row tile
            pl.BlockSpec((D, H), lambda i: (0, 0)),    # fc1 weight (resident)
            pl.BlockSpec((1, H), lambda i: (0, 0)),    # fc1 bias
            pl.BlockSpec((H, D), lambda i: (0, 0)),    # fc2 weight (resident)
            pl.BlockSpec((1, D), lambda i: (0, 0)),    # fc2 bias
        ],
        out_specs=pl.BlockSpec((tm, D), lambda i: (i, 0)),
        compiler_params=pltpu.CompilerParams(
            dimension_semantics=("parallel",),
            vmem_limit_bytes=vmem_limit,
        ),
    )(x2, w1, b1, w2, b2)

    return out.reshape(orig_shape)


def _adapter_ref(x, w1, b1, w2, b2, skip_connect):
    h = x @ w1 + b1
    h = 0.5 * h * (1.0 + lax.erf(h * jnp.float32(0.7071067811865476)))
    y = h @ w2 + b2
    return x + y if skip_connect else y


if __name__ == "__main__":
    key = jax.random.PRNGKey(0)
    B, L, D = 2, 64, 128          # batch, seq, D_features
    H = 192                       # dim_mlp (module default)

    k_x, k_w1, k_b1, k_w2, k_b2 = jax.random.split(key, 5)
    x = jax.random.normal(k_x, (B, L, D), jnp.float32)
    # PyTorch nn.Linear default init: U(-1/sqrt(fan_in), 1/sqrt(fan_in))
    lim1 = 1.0 / np.sqrt(D)
    lim2 = 1.0 / np.sqrt(H)
    fc1_w = jax.random.uniform(k_w1, (D, H), jnp.float32, -lim1, lim1)
    fc1_b = jax.random.uniform(k_b1, (H,), jnp.float32, -lim1, lim1)
    fc2_w = jax.random.uniform(k_w2, (H, D), jnp.float32, -lim2, lim2)
    fc2_b = jax.random.uniform(k_b2, (D,), jnp.float32, -lim2, lim2)

    ok = True
    for skip in (True, False):
        out = adapter_forward(x, fc1_w, fc1_b, fc2_w, fc2_b, skip_connect=skip)
        jax.block_until_ready(out)
        assert out.shape == (B, L, D)
        ref = _adapter_ref(x, fc1_w, fc1_b, fc2_w, fc2_b, skip)
        diff = float(jnp.max(jnp.abs(out - ref)))
        ok = ok and np.isfinite(diff) and diff < 1e-2   # f32 matmul operands -> tight

    # Row count that is not a power-of-two tile (M = 2*60 = 120): exercises the
    # no-wrapper-pad path (single sublane-rounded block, no jnp.pad HBM round trip).
    x_r = jax.random.normal(k_x, (2, 60, D), jnp.float32)
    out_r = adapter_forward(x_r, fc1_w, fc1_b, fc2_w, fc2_b, skip_connect=True)
    jax.block_until_ready(out_r)
    assert out_r.shape == (2, 60, D)
    ref_r = _adapter_ref(x_r, fc1_w, fc1_b, fc2_w, fc2_b, True)
    diff_r = float(jnp.max(jnp.abs(out_r - ref_r)))
    ok = ok and np.isfinite(diff_r) and diff_r < 1e-2

    if ok:
        print("KERNEL_OK")
</pallas_src>

<mosaic_0001>
module attributes {stable_mosaic.version = 11 : i64} {
  func.func @_adapter_kernel(%arg0: i32, %arg1: memref<128x128xf32, #tpu.memory_space<vmem>>, %arg2: memref<128x192xf32, #tpu.memory_space<vmem>>, %arg3: memref<1x192xf32, #tpu.memory_space<vmem>>, %arg4: memref<192x128xf32, #tpu.memory_space<vmem>>, %arg5: memref<1x128xf32, #tpu.memory_space<vmem>>, %arg6: memref<128x128xf32, #tpu.memory_space<vmem>>) attributes {dimension_semantics = [#tpu.dimension_semantics<parallel>], iteration_bounds = array<i64: 1>, scalar_prefetch = 0 : i64, scratch_operands = 0 : i64, tpu.core_type = #tpu.core_type<tc>, window_params = [{transform_indices = @transform_0, window_bounds = array<i64: 128, 128>}, {pipeline_mode = #tpu.pipeline_mode<synchronous>, transform_indices = @transform_1, window_bounds = array<i64: 128, 192>}, {pipeline_mode = #tpu.pipeline_mode<synchronous>, transform_indices = @transform_2, window_bounds = array<i64: 1, 192>}, {pipeline_mode = #tpu.pipeline_mode<synchronous>, transform_indices = @transform_3, window_bounds = array<i64: 192, 128>}, {pipeline_mode = #tpu.pipeline_mode<synchronous>, transform_indices = @transform_4, window_bounds = array<i64: 1, 128>}, {transform_indices = @transform_5, window_bounds = array<i64: 128, 128>}]} {
    %c0 = arith.constant 0 : index
    %c0_0 = arith.constant 0 : index
    %0 = vector.load %arg1[%c0, %c0_0] : memref<128x128xf32, #tpu.memory_space<vmem>>, vector<128x128xf32>
    %c0_1 = arith.constant 0 : index
    %c0_2 = arith.constant 0 : index
    %1 = vector.load %arg2[%c0_1, %c0_2] : memref<128x192xf32, #tpu.memory_space<vmem>>, vector<128x192xf32>
    %cst = arith.constant dense<0.000000e+00> : vector<128x192xf32>
    %2 = tpu.matmul %0, %1, %cst {dimension_numbers = #tpu.dot_dimension_numbers<[1], [0], [0], [1], [0, 0, 1, 1], [], []>} : vector<128x128xf32>, vector<128x192xf32>, vector<128x192xf32> -> vector<128x192xf32>
    %c0_3 = arith.constant 0 : index
    %c0_4 = arith.constant 0 : index
    %3 = vector.load %arg3[%c0_3, %c0_4] : memref<1x192xf32, #tpu.memory_space<vmem>>, vector<1x192xf32>
    %4 = vector.broadcast %3 : vector<1x192xf32> to vector<128x192xf32>
    %5 = arith.addf %2, %4 : vector<128x192xf32>
    %cst_5 = arith.constant 5.000000e-01 : f32
    %6 = vector.broadcast %cst_5 : f32 to vector<128x192xf32>
    %7 = arith.mulf %6, %5 : vector<128x192xf32>
    %cst_6 = arith.constant 0.707106769 : f32
    %8 = vector.broadcast %cst_6 : f32 to vector<128x192xf32>
    %9 = arith.mulf %5, %8 : vector<128x192xf32>
    %10 = math.erf %9 : vector<128x192xf32>
    %cst_7 = arith.constant 1.000000e+00 : f32
    %11 = vector.broadcast %cst_7 : f32 to vector<128x192xf32>
    %12 = arith.addf %11, %10 : vector<128x192xf32>
    %13 = arith.mulf %7, %12 : vector<128x192xf32>
    %c0_8 = arith.constant 0 : index
    %c0_9 = arith.constant 0 : index
    %14 = vector.load %arg4[%c0_8, %c0_9] : memref<192x128xf32, #tpu.memory_space<vmem>>, vector<192x128xf32>
    %cst_10 = arith.constant dense<0.000000e+00> : vector<128x128xf32>
    %15 = tpu.matmul %13, %14, %cst_10 {dimension_numbers = #tpu.dot_dimension_numbers<[1], [0], [0], [1], [0, 0, 1, 1], [], []>} : vector<128x192xf32>, vector<192x128xf32>, vector<128x128xf32> -> vector<128x128xf32>
    %c0_11 = arith.constant 0 : index
    %c0_12 = arith.constant 0 : index
    %16 = vector.load %arg5[%c0_11, %c0_12] : memref<1x128xf32, #tpu.memory_space<vmem>>, vector<1x128xf32>
    %17 = vector.broadcast %16 : vector<1x128xf32> to vector<128x128xf32>
    %18 = arith.addf %15, %17 : vector<128x128xf32>
    %19 = arith.addf %18, %0 : vector<128x128xf32>
    %c0_13 = arith.constant 0 : index
    %c0_14 = arith.constant 0 : index
    %20 = vector.load %arg6[%c0_13, %c0_14] : memref<128x128xf32, #tpu.memory_space<vmem>>, vector<128x128xf32>
    tpu.vector_store %arg6[%c0_13, %c0_14], %19 {strides = array<i32>} : memref<128x128xf32, #tpu.memory_space<vmem>>, vector<128x128xf32>,
    return
  }
  func.func @transform_0(%arg0: i32) -> (i32, i32) {
    %c0_i32 = arith.constant 0 : i32
    %c0_i32_0 = arith.constant 0 : i32
    return %arg0, %c0_i32 : i32, i32
  }
  func.func @transform_1(%arg0: i32) -> (i32, i32) {
    %c0_i32 = arith.constant 0 : i32
    %c0_i32_0 = arith.constant 0 : i32
    %c0_i32_1 = arith.constant 0 : i32
    return %c0_i32, %c0_i32_0 : i32, i32
  }
  func.func @transform_2(%arg0: i32) -> (i32, i32) {
    %c0_i32 = arith.constant 0 : i32
    %c0_i32_0 = arith.constant 0 : i32
    %c0_i32_1 = arith.constant 0 : i32
    return %c0_i32, %c0_i32_0 : i32, i32
  }
  func.func @transform_3(%arg0: i32) -> (i32, i32) {
    %c0_i32 = arith.constant 0 : i32
    %c0_i32_0 = arith.constant 0 : i32
    %c0_i32_1 = arith.constant 0 : i32
    return %c0_i32, %c0_i32_0 : i32, i32
  }
  func.func @transform_4(%arg0: i32) -> (i32, i32) {
    %c0_i32 = arith.constant 0 : i32
    %c0_i32_0 = arith.constant 0 : i32
    %c0_i32_1 = arith.constant 0 : i32
    return %c0_i32, %c0_i32_0 : i32, i32
  }
  func.func @transform_5(%arg0: i32) -> (i32, i32) {
    %c0_i32 = arith.constant 0 : i32
    %c0_i32_0 = arith.constant 0 : i32
    return %arg0, %c0_i32 : i32, i32
  }
}

</mosaic_0001>

<bundles_post_ra>
// kernel: tpu_custom_call.1
= control target key start
LH: loop header
LB: loop body
LE: loop exit
PB: predicated region body
PF: predicated region fallthrough
CT: control target
= control target key end

     0   :  { %v877_v7 = vmov 0.0   ;;  %v878_v8 = vmov 0.0|0.0   ;;  %s1400_s0 = inlined_call_operand.vmem [shape: f32[128,128], index: 0, kind: input, shape index: {}]   ;;  %s1401_s1 = inlined_call_operand.vmem [shape: f32[128,192], index: 1, kind: input, shape index: {}]   ;;  %s1402_s2 = inlined_call_operand.vmem [shape: f32[1,192], index: 2, kind: input, shape index: {}]   ;;  %s1403_s3 = inlined_call_operand.vmem [shape: f32[192,128], index: 3, kind: input, shape index: {}]   ;;  %s1404_s4 = inlined_call_operand.vmem [shape: f32[1,128], index: 4, kind: input, shape index: {}]   ;;  %s1405_s5 = inlined_call_operand.hbm [shape: f32[128,128], index: 5, kind: output, shape index: {}]  }
   0x1   :  { %v38_v0 = vld [vmem:[%s1401_s1 + $0x8] sm:$0xff]  ;;  %v40_v1 = vld [vmem:[%s1401_s1 + $0x18] sm:$0xff]  ;;  %v37_v2 = vld [vmem:[%s1401_s1] sm:$0xff]  ;;  %145 = vmatprep.mubr.f32.mxu0 %v877_v7  ;;  %760 = vmatprep.subr.bf16.mxu1 %v878_v8 }
   0x2   :  { %v692_v3 = vpack.c.bf16 %v40_v1, %v38_v0  ;;  %v39_v4 = vld [vmem:[%s1401_s1 + $0x10] sm:$0xff]  ;;  %v42_v5 = vld [vmem:[%s1401_s1 + $0x28] sm:$0xff]  ;;  %v44_v6 = vld [vmem:[%s1401_s1 + $0x38] sm:$0xff] }
   0x3   :  { %v694_v9 = vpack.c.bf16 %v39_v4, %v37_v2  ;;  %v696_v10 = vpack.c.bf16 %v44_v6, %v42_v5  ;;  %v41_v11 = vld [vmem:[%s1401_s1 + $0x20] sm:$0xff]  ;;  %v43_v12 = vld [vmem:[%s1401_s1 + $0x30] sm:$0xff]  ;;  %v46_v13 = vld [vmem:[%s1401_s1 + $0x48] sm:$0xff] }
   0x4   :  { %693 = vmatprep.subr.bf16.mxu0 %v692_v3  ;;  %v48_v14 = vld [vmem:[%s1401_s1 + $0x58] sm:$0xff]  ;;  %v698_v15 = vpack.c.bf16 %v43_v12, %v41_v11  ;;  %v45_v17 = vld [vmem:[%s1401_s1 + $0x40] sm:$0xff]  ;;  %v47_v18 = vld [vmem:[%s1401_s1 + $0x50] sm:$0xff] }
   0x5   :  { %695 = vmatpush1.bf16.msra.mxu0 %v694_v9  ;;  %v700_v16 = vpack.c.bf16 %v48_v14, %v46_v13  ;;  %v50_v19 = vld [vmem:[%s1401_s1 + $0x68] sm:$0xff]  ;;  %v52_v20 = vld [vmem:[%s1401_s1 + $0x78] sm:$0xff]  ;;  %v702_v21 = vpack.c.bf16 %v47_v18, %v45_v17  ;;  %v49_v23 = vld [vmem:[%s1401_s1 + $0x60] sm:$0xff] }
   0x6   :  { %697 = vmatprep.subr.bf16.mxu0 %v696_v10  ;;  %v704_v22 = vpack.c.bf16 %v52_v20, %v50_v19  ;;  %v51_v24 = vld [vmem:[%s1401_s1 + $0x70] sm:$0xff]  ;;  %v54_v25 = vld [vmem:[%s1401_s1 + $0x88] sm:$0xff]  ;;  %v56_v26 = vld [vmem:[%s1401_s1 + $0x98] sm:$0xff] }
   0x7   :  { %v706_v27 = vpack.c.bf16 %v51_v24, %v49_v23  ;;  %v708_v28 = vpack.c.bf16 %v56_v26, %v54_v25  ;;  %v53_v29 = vld [vmem:[%s1401_s1 + $0x80] sm:$0xff]  ;;  %v55_v30 = vld [vmem:[%s1401_s1 + $0x90] sm:$0xff]  ;;  %v58_v31 = vld [vmem:[%s1401_s1 + $0xa8] sm:$0xff] }
   0x8   :  { %v60_v32 = vld [vmem:[%s1401_s1 + $0xb8] sm:$0xff]  ;;  %v710_v33 = vpack.c.bf16 %v55_v30, %v53_v29  ;;  %v402_v34 = vld [vmem:[%s1403_s3] sm:$0xff]  ;;  %v403_v35 = vld [vmem:[%s1403_s3 + $0x8] sm:$0xff] }
   0x9   :  { %699 = vmatpush1.bf16.msra.mxu0 %v698_v15  ;;  %v712_v36 = vpack.c.bf16 %v60_v32, %v58_v31  ;;  %v57_v37 = vld [vmem:[%s1401_s1 + $0xa0] sm:$0xff]  ;;  %v59_v38 = vld [vmem:[%s1401_s1 + $0xb0] sm:$0xff]  ;;  %v62_v39 = vld [vmem:[%s1401_s1 + $0xc8] sm:$0xff]  ;;  %v725_v40 = vpack.c.bf16 %v403_v35, %v402_v34 }
   0xa   :  { %701 = vmatprep.subr.bf16.mxu0 %v700_v16  ;;  %v64_v41 = vld [vmem:[%s1401_s1 + $0xd8] sm:$0xff]  ;;  %v404_v42 = vld [vmem:[%s1403_s3 + $0x10] sm:$0xff]  ;;  %v714_v44 = vpack.c.bf16 %v59_v38, %v57_v37  ;;  %v61_v45 = vld [vmem:[%s1401_s1 + $0xc0] sm:$0xff] }
   0xb   :  { %v405_v43 = vld [vmem:[%s1403_s3 + $0x18] sm:$0xff]  ;;  %772 = vmatpush1.bf16.msra.mxu1 %v725_v40  ;;  %v716_v46 = vpack.c.bf16 %v64_v41, %v62_v39  ;;  %v63_v47 = vld [vmem:[%s1401_s1 + $0xd0] sm:$0xff]  ;;  %v66_v48 = vld [vmem:[%s1401_s1 + $0xe8] sm:$0xff] }
   0xc   :  { %761 = vmatprep.subr.bf16.mxu1 %v878_v8  ;;  %v728_v49 = vpack.c.bf16 %v405_v43, %v404_v42 }
   0xd   :  { %703 = vmatpush1.bf16.msra.mxu0 %v702_v21 }
   0xe   :  { %705 = vmatprep.subr.bf16.mxu0 %v704_v22 }
  0x11   :  { %707 = vmatpush1.bf16.msra.mxu0 %v706_v27 }
  0x12   :  { %709 = vmatprep.subr.bf16.mxu0 %v708_v28 }
  0x15   :  { %711 = vmatpush1.bf16.msra.mxu0 %v710_v33 }
  0x16   :  { %713 = vmatprep.subr.bf16.mxu0 %v712_v36 }
  0x17   :  { %10 = vsyncpa [#allocation3], 0  ;;  %v68_v50 = vld [vmem:[%s1401_s1 + $0xf8] sm:$0xff]  ;;  %v406_v51 = vld [vmem:[%s1403_s3 + $0x20] sm:$0xff]  ;;  %773 = vmatpush1.bf16.msra.mxu1 %v728_v49  ;;  %v718_v53 = vpack.c.bf16 %v63_v47, %v61_v45  ;;  %v71_v39 = vlaneseq  ;;  %vm433_vm0 = vcmask 523264  }
  0x18   :  { %v407_v52 = vld [vmem:[%s1403_s3 + $0x28] sm:$0xff]  ;;  %762 = vmatprep.subr.bf16.mxu1 %v878_v8  ;;  %v720_v54 = vpack.c.bf16 %v68_v50, %v66_v48  ;;  %v65_v55 = vld [vmem:[%s1401_s1 + $0xe0] sm:$0xff]  ;;  %v67_v56 = vld [vmem:[%s1401_s1 + $0xf0] sm:$0xff] }
  0x19   :  { %715 = vmatpush1.bf16.msra.mxu0 %v714_v44  ;;  %v731_v57 = vpack.c.bf16 %v407_v52, %v406_v51  ;;  %v408_v58 = vld [vmem:[%s1403_s3 + $0x30] sm:$0xff]  ;;  %v409_v59 = vld [vmem:[%s1403_s3 + $0x38] sm:$0xff]  ;;  %v722_v60 = vpack.c.bf16 %v67_v56, %v65_v55  ;;  %v410_v62 = vld [vmem:[%s1403_s3 + $0x40] sm:$0xff] }
  0x1a   :  { %717 = vmatprep.subr.bf16.mxu0 %v716_v46  ;;  %v734_v61 = vpack.c.bf16 %v409_v59, %v408_v58  ;;  %v411_v63 = vld [vmem:[%s1403_s3 + $0x48] sm:$0xff]  ;;  %v1046_v0 = vld [vmem:[%s1400_s0] sm:$0xff]  ;;  %v412_v2 = vld [vmem:[%s1403_s3 + $0x50] sm:$0xff] }
  0x1b   :  { %774 = vmatpush1.bf16.msra.mxu1 %v731_v57  ;;  %v737_v1 = vpack.c.bf16 %v411_v63, %v410_v62  ;;  %v413_v3 = vld [vmem:[%s1403_s3 + $0x58] sm:$0xff]  ;;  %v1061_v4 = vld [vmem:[%s1400_s0 + $0x8] sm:$0xff]  ;;  %v414_v6 = vld [vmem:[%s1403_s3 + $0x60] sm:$0xff] }
  0x1c   :  { %763 = vmatprep.subr.bf16.mxu1 %v878_v8  ;;  %v740_v5 = vpack.c.bf16 %v413_v3, %v412_v2  ;;  %v415_v9 = vld [vmem:[%s1403_s3 + $0x68] sm:$0xff]  ;;  %v1076_v10 = vld [vmem:[%s1400_s0 + $0x10] sm:$0xff]  ;;  %v1085_v12 = vld [vmem:[%s1400_s0 + $0x18] sm:$0xff] }
  0x1d   :  { %719 = vmatpush1.bf16.msra.mxu0 %v718_v53  ;;  %v743_v11 = vpack.c.bf16 %v415_v9, %v414_v6  ;;  %v1094_v13 = vld [vmem:[%s1400_s0 + $0x20] sm:$0xff]  ;;  %v1102_v14 = vld [vmem:[%s1400_s0 + $0x28] sm:$0xff]  ;;  %v1110_v15 = vld [vmem:[%s1400_s0 + $0x30] sm:$0xff] }
  0x1e   :  { %721 = vmatprep.subr.bf16.mxu0 %v720_v54  ;;  %v1118_v16 = vld [vmem:[%s1400_s0 + $0x38] sm:$0xff]  ;;  %v1126_v17 = vld [vmem:[%s1400_s0 + $0x40] sm:$0xff]  ;;  %v1133_v18 = vld [vmem:[%s1400_s0 + $0x48] sm:$0xff] }
  0x1f   :  { %775 = vmatpush1.bf16.msra.mxu1 %v734_v61  ;;  %v1140_v19 = vld [vmem:[%s1400_s0 + $0x50] sm:$0xff]  ;;  %v1147_v20 = vld [vmem:[%s1400_s0 + $0x58] sm:$0xff]  ;;  %v1154_v21 = vld [vmem:[%s1400_s0 + $0x60] sm:$0xff] }
  0x20   :  { %764 = vmatprep.subr.bf16.mxu1 %v878_v8  ;;  %v1161_v22 = vld [vmem:[%s1400_s0 + $0x68] sm:$0xff]  ;;  %v1168_v23 = vld [vmem:[%s1400_s0 + $0x70] sm:$0xff]  ;;  %v1175_v24 = vld [vmem:[%s1400_s0 + $0x78] sm:$0xff] }
  0x21   :  { %723 = vmatpush1.bf16.msra.mxu0 %v722_v60  ;;  %v416_v25 = vld [vmem:[%s1403_s3 + $0x70] sm:$0xff]  ;;  %v417_v26 = vld [vmem:[%s1403_s3 + $0x78] sm:$0xff]  ;;  %v419_v28 = vld [vmem:[%s1403_s3 + $0x88] sm:$0xff] }
  0x22   :  { %724 = vmatprep.subr.bf16.mxu0 %v878_v8  ;;  %v746_v27 = vpack.c.bf16 %v417_v26, %v416_v25  ;;  %v420_v30 = vld [vmem:[%s1403_s3 + $0x90] sm:$0xff]  ;;  %v421_v31 = vld [vmem:[%s1403_s3 + $0x98] sm:$0xff]  ;;  %v422_v33 = vld [vmem:[%s1403_s3 + $0xa0] sm:$0xff] }
  0x23   :  { %776 = vmatpush1.bf16.msra.mxu1 %v737_v1  ;;  %v752_v32 = vpack.c.bf16 %v421_v31, %v420_v30  ;;  %v423_v34 = vld [vmem:[%s1403_s3 + $0xa8] sm:$0xff]  ;;  %v424_v36 = vld [vmem:[%s1403_s3 + $0xb0] sm:$0xff]  ;;  %v425_v37 = vld [vmem:[%s1403_s3 + $0xb8] sm:$0xff] }
  0x24   :  { %146 = vmatmul.mubr.f32.vlgmr.msra.gmra.mrb[0].mxu0 %v1046_v0  ;;  %765 = vmatprep.subr.bf16.mxu1 %v878_v8  ;;  %v755_v35 = vpack.c.bf16 %v423_v34, %v422_v33  ;;  %v758_v38 = vpack.c.bf16 %v425_v37, %v424_v36  ;;  %v69_v42 = vld [vmem:[%s1402_s2] sm:$0x3] }
  0x25   :  { %151 = vmatprep.mubr.f32.mxu0 %v877_v7  ;;  %726 = vmatpush1.bf16.msra.mxu0 %v725_v40  ;;  %v72_v40 = vshrl.u32 %v71_v39, 7 }
  0x26   :  { %727 = vmatprep.subr.bf16.mxu0 %v878_v8 }
  0x27   :  { %777 = vmatpush1.bf16.msra.mxu1 %v740_v5  ;;  %v73_v41 = vsub.s32 0, %v72_v40  ;;  %v77_v43 = vsub.s32 1, %v72_v40 }
  0x28   :  { %152 = vmatmul.mubr.f32.gmra.mrb[2].mxu0 %v1061_v4  ;;  %766 = vmatprep.subr.bf16.mxu1 %v878_v8 }
  0x29   :  { %157 = vmatprep.mubr.f32.mxu0 %v877_v7  ;;  %729 = vmatpush1.bf16.msra.mxu0 %v728_v49  ;;  %v1219_v44 = vrot.slane %v69_v42, %v73_v41  ;;  %v1221_v45 = vrot.slane %v69_v42, %v77_v43 }
  0x2a   :  { %730 = vmatprep.subr.bf16.mxu0 %v878_v8 }
  0x2b   :  { %778 = vmatpush1.bf16.msra.mxu1 %v743_v11 }
  0x2c   :  { %158 = vmatmul.mubr.f32.gmra.mrb[4].mxu0 %v1076_v10  ;;  %767 = vmatprep.subr.bf16.mxu1 %v878_v8 }
  0x2d   :  { %163 = vmatprep.mubr.f32.mxu0 %v877_v7  ;;  %732 = vmatpush1.bf16.msra.mxu0 %v731_v57 }
  0x2e   :  { %733 = vmatprep.subr.bf16.mxu0 %v878_v8 }
  0x2f   :  { %779 = vmatpush1.bf16.msra.mxu1 %v746_v27 }
  0x30   :  { %164 = vmatmul.mubr.f32.gmra.mrb[6].mxu0 %v1085_v12  ;;  %768 = vmatprep.subr.bf16.mxu1 %v878_v8 }
  0x31   :  { %169 = vmatprep.mubr.f32.mxu0 %v877_v7  ;;  %735 = vmatpush1.bf16.msra.mxu0 %v734_v61 }
  0x32   :  { %736 = vmatprep.subr.bf16.mxu0 %v878_v8 }
  0x34   :  { %170 = vmatmul.mubr.f32.gmra.mrb[8].mxu0 %v1094_v13 }
  0x35   :  { %175 = vmatprep.mubr.f32.mxu0 %v877_v7  ;;  %738 = vmatpush1.bf16.msra.mxu0 %v737_v1 }
  0x36   :  { %739 = vmatprep.subr.bf16.mxu0 %v878_v8 }
  0x38   :  { %176 = vmatmul.mubr.f32.gmra.mrb[10].mxu0 %v1102_v14 }
  0x39   :  { %181 = vmatprep.mubr.f32.mxu0 %v877_v7  ;;  %741 = vmatpush1.bf16.msra.mxu0 %v740_v5 }
  0x3a   :  { %742 = vmatprep.subr.bf16.mxu0 %v878_v8 }
  0x3c   :  { %182 = vmatmul.mubr.f32.gmra.mrb[12].mxu0 %v1110_v15 }
  0x3d   :  { %187 = vmatprep.mubr.f32.mxu0 %v877_v7  ;;  %744 = vmatpush1.bf16.msra.mxu0 %v743_v11 }
  0x3e   :  { %745 = vmatprep.subr.bf16.mxu0 %v878_v8 }
  0x40   :  { %188 = vmatmul.mubr.f32.gmra.mrb[14].mxu0 %v1118_v16 }
  0x41   :  { %193 = vmatprep.mubr.f32.mxu0 %v877_v7  ;;  %747 = vmatpush1.bf16.msra.mxu0 %v746_v27 }
  0x42   :  { %748 = vmatprep.subr.bf16.mxu0 %v878_v8 }
  0x44   :  { %194 = vmatmul.mubr.f32.gmra.mrb[16].mxu0 %v1126_v17 }
  0x45   :  { %199 = vmatprep.mubr.f32.mxu0 %v877_v7 }
  0x48   :  { %200 = vmatmul.mubr.f32.gmra.mrb[18].mxu0 %v1133_v18 }
  0x49   :  { %205 = vmatprep.mubr.f32.mxu0 %v877_v7 }
  0x4c   :  { %206 = vmatmul.mubr.f32.gmra.mrb[20].mxu0 %v1140_v19 }
  0x4d   :  { %211 = vmatprep.mubr.f32.mxu0 %v877_v7 }
  0x50   :  { %212 = vmatmul.mubr.f32.gmra.mrb[22].mxu0 %v1147_v20 }
  0x51   :  { %217 = vmatprep.mubr.f32.mxu0 %v877_v7 }
  0x54   :  { %218 = vmatmul.mubr.f32.gmra.mrb[24].mxu0 %v1154_v21 }
  0x55   :  { %223 = vmatprep.mubr.f32.mxu0 %v877_v7 }
  0x58   :  { %224 = vmatmul.mubr.f32.gmra.mrb[26].mxu0 %v1161_v22 }
  0x59   :  { %229 = vmatprep.mubr.f32.mxu0 %v877_v7 }
  0x5c   :  { %230 = vmatmul.mubr.f32.gmra.mrb[28].mxu0 %v1168_v23 }
  0x5d   :  { %235 = vmatprep.mubr.f32.mxu0 %v877_v7  ;;  %v418_v7 = vld [vmem:[%s1403_s3 + $0x80] sm:$0xff] }
  0x5e   :  { %v749_v29 = vpack.c.bf16 %v419_v28, %v418_v7 }
  0x60   :  { %236 = vmatmul.mubr.f32.gmra.mrb[30].mxu0 %v1175_v24  ;;  %780 = vmatpush1.bf16.msra.mxu1 %v749_v29 }
  0x61   :  { %750 = vmatpush1.bf16.msra.mxu0 %v749_v29  ;;  %769 = vmatprep.subr.bf16.mxu1 %v878_v8 }
  0x62   :  { %751 = vmatprep.subr.bf16.mxu0 %v878_v8 }
  0x64   :  { %781 = vmatpush1.bf16.msra.mxu1 %v752_v32 }
  0x65   :  { %753 = vmatpush1.bf16.msra.mxu0 %v752_v32  ;;  %770 = vmatprep.subr.bf16.mxu1 %v878_v8 }
  0x66   :  { %754 = vmatprep.subr.bf16.mxu0 %v878_v8 }
  0x68   :  { %782 = vmatpush1.bf16.msra.mxu1 %v755_v35 }
  0x69   :  { %756 = vmatpush1.bf16.msra.mxu0 %v755_v35  ;;  %771 = vmatprep.subr.bf16.mxu1 %v878_v8 }
  0x6a   :  { %757 = vmatprep.subr.bf16.mxu0 %v878_v8 }
  0x6c   :  { %783 = vmatpush1.bf16.msra.mxu1 %v758_v38 }
  0x6d   :  { %759 = vmatpush1.bf16.msra.mxu0 %v758_v38 }
  0xf7   :  { %v147_v46 = vpop.f32.mrb[0].mxu0 }
  0xf8   :  { %v148_v47 = vadd.f32 %v147_v46, %v1219_v44  ;;  %v149_v48 = vpop.f32.mrb[1].mxu0 }
  0xf9   :  { %v150_v8 = vadd.f32 %v149_v48, %v1221_v45 }
  0xfa   :  { %v274_v49 = vmul.f32 0.70710677, %v148_v47  ;;  %v242_v30 = vmul.f32 0.5, %v148_v47 }
  0xfb   :  { %v275_v50 = vmul.f32 0.70710677, %v150_v8  ;;  %v153_v51 = vpop.f32.mrb[2].mxu0  ;;  %v243_v27 = vmul.f32 0.5, %v150_v8 }
  0xfc   :  { %789 = verf.f32 %v274_v49  ;;  %v154_v52 = vadd.f32 %v153_v51, %v1219_v44  ;;  %v155_v53 = vpop.f32.mrb[3].mxu0 }
  0xfd   :  { %791 = verf.f32 %v275_v50  ;;  %v156_v54 = vadd.f32 %v155_v53, %v1221_v45 }
  0xfe   :  { %v276_v55 = vmul.f32 0.70710677, %v154_v52  ;;  %v244_v46 = vmul.f32 0.5, %v154_v52 }
  0xff   :  { %v277_v56 = vmul.f32 0.70710677, %v156_v54  ;;  %v159_v57 = vpop.f32.mrb[4].mxu0  ;;  %v245_v40 = vmul.f32 0.5, %v156_v54 }
 0x100   :  { %793 = verf.f32 %v276_v55  ;;  %v160_v58 = vadd.f32 %v159_v57, %v1219_v44  ;;  %v161_v59 = vpop.f32.mrb[5].mxu0 }
 0x101   :  { %795 = verf.f32 %v277_v56  ;;  %v162_v60 = vadd.f32 %v161_v59, %v1221_v45 }
 0x102   :  { %v278_v61 = vmul.f32 0.70710677, %v160_v58 }
 0x103   :  { %v279_v62 = vmul.f32 0.70710677, %v162_v60  ;;  %v165_v63 = vpop.f32.mrb[6].mxu0  ;;  %v247_v56 = vmul.f32 0.5, %v162_v60 }
 0x104   :  { %797 = verf.f32 %v278_v61  ;;  %v1230_v1 = vadd.f32 %v165_v63, %v1219_v44  ;;  %v167_v2 = vpop.f32.mrb[7].mxu0  ;;  %v246_v61 = vmul.f32 0.5, %v160_v58 }
 0x105   :  { %799 = verf.f32 %v279_v62  ;;  %v168_v3 = vadd.f32 %v167_v2, %v1221_v45 }
 0x106   :  { %v790_v5 = vpop.eup %789  ;;  %v280_v6 = vmul.f32 0.70710677, %v1230_v1 }
 0x107   :  { %v792_v9 = vpop.eup %791  ;;  %v338_v11 = vadd.f32 1.0, %v790_v5  ;;  %v281_v25 = vmul.f32 0.70710677, %v168_v3  ;;  %v171_v26 = vpop.f32.mrb[8].mxu0 }
 0x108   :  { %v339_v7 = vadd.f32 1.0, %v792_v9  ;;  %801 = verf.f32 %v280_v6  ;;  %v1235_v28 = vadd.f32 %v171_v26, %v1219_v44  ;;  %v173_v29 = vpop.f32.mrb[9].mxu0  ;;  %v249_v26 = vmul.f32 0.5, %v168_v3 }
 0x109   :  { %803 = verf.f32 %v281_v25  ;;  %v1238_v31 = vadd.f32 %v173_v29, %v1221_v45  ;;  %v370_v36 = vmul.f32 %v338_v11, %v242_v30  ;;  %v248_v29 = vmul.f32 0.5, %v1230_v1 }
 0x10a   :  { %v794_v32 = vpop.eup %793  ;;  %v371_v33 = vmul.f32 %v339_v7, %v243_v27  ;;  %v282_v34 = vmul.f32 0.70710677, %v1235_v28 }
 0x10b   :  { %v796_v35 = vpop.eup %795  ;;  %v340_v37 = vadd.f32 1.0, %v794_v32  ;;  %v283_v38 = vmul.f32 0.70710677, %v1238_v31  ;;  %v177_v39 = vpop.f32.mrb[10].mxu0 }
 0x10c   :  { %v341_v41 = vadd.f32 1.0, %v796_v35  ;;  %805 = verf.f32 %v282_v34  ;;  %v1243_v42 = vadd.f32 %v177_v39, %v1219_v44  ;;  %v179_v43 = vpop.f32.mrb[11].mxu0  ;;  %676 = vmatprep.mubr.msk.f32.mxu0 %vm433_vm0, %v371_v33  ;;  %v251_v39 = vmul.f32 0.5, %v1238_v31 }
 0x10d   :  { %807 = verf.f32 %v283_v38  ;;  %v1247_v47 = vadd.f32 %v179_v43, %v1221_v45  ;;  %547 = vmatmul.mubr.f32.vlgmr.msra.gmra.mrb[32].mxu0 %v370_v36  ;;  %v372_v55 = vmul.f32 %v340_v37, %v244_v46  ;;  %v250_v43 = vmul.f32 0.5, %v1235_v28 }
 0x10e   :  { %v798_v48 = vpop.eup %797  ;;  %v373_v8 = vmul.f32 %v341_v41, %v245_v40  ;;  %v284_v49 = vmul.f32 0.70710677, %v1243_v42 }
 0x10f   :  { %v800_v50 = vpop.eup %799  ;;  %v342_v51 = vadd.f32 1.0, %v798_v48  ;;  %v285_v53 = vmul.f32 0.70710677, %v1247_v47  ;;  %v183_v54 = vpop.f32.mrb[12].mxu0 }
 0x110   :  { %809 = verf.f32 %v284_v49  ;;  %v1252_v57 = vadd.f32 %v183_v54, %v1219_v44  ;;  %v185_v52 = vpop.f32.mrb[13].mxu0  ;;  %677 = vmatprep.mubr.msk.f32.mxu0 %vm433_vm0, %v373_v8  ;;  %v343_v59 = vadd.f32 1.0, %v800_v50 }
 0x111   :  { %811 = verf.f32 %v285_v53  ;;  %v1256_v62 = vadd.f32 %v185_v52, %v1221_v45  ;;  %552 = vmatmul.mubr.f32.gmra.mrb[34].mxu0 %v372_v55  ;;  %v374_v25 = vmul.f32 %v342_v51, %v246_v61  ;;  %v253_v55 = vmul.f32 0.5, %v1247_v47 }
 0x112   :  { %v802_v63 = vpop.eup %801  ;;  %v286_v2 = vmul.f32 0.70710677, %v1252_v57  ;;  %v375_v5 = vmul.f32 %v343_v59, %v247_v56  ;;  %v252_v59 = vmul.f32 0.5, %v1243_v42 }
 0x113   :  { %v804_v6 = vpop.eup %803  ;;  %v344_v60 = vadd.f32 1.0, %v802_v63  ;;  %v287_v9 = vmul.f32 0.70710677, %v1256_v62  ;;  %v189_v11 = vpop.f32.mrb[14].mxu0 }
 0x114   :  { %v345_v27 = vadd.f32 1.0, %v804_v6  ;;  %813 = verf.f32 %v286_v2  ;;  %v1261_v58 = vadd.f32 %v189_v11, %v1219_v44  ;;  %v191_v7 = vpop.f32.mrb[15].mxu0  ;;  %678 = vmatprep.mubr.msk.f32.mxu1 %vm433_vm0, %v375_v5 }
 0x115   :  { %815 = verf.f32 %v287_v9  ;;  %v1266_v30 = vadd.f32 %v191_v7, %v1221_v45  ;;  %557 = vmatmul.mubr.f32.vlgmr.msra.gmra.mrb[0].mxu1 %v374_v25  ;;  %v376_v38 = vmul.f32 %v344_v60, %v248_v29  ;;  %v255_v25 = vmul.f32 0.5, %v1256_v62 }
 0x116   :  { %v806_v32 = vpop.eup %805  ;;  %v377_v33 = vmul.f32 %v345_v27, %v249_v26  ;;  %v288_v34 = vmul.f32 0.70710677, %v1261_v58  ;;  %v254_v7 = vmul.f32 0.5, %v1252_v57 }
 0x117   :  { %v808_v3 = vpop.eup %807  ;;  %v346_v35 = vadd.f32 1.0, %v806_v32  ;;  %v289_v36 = vmul.f32 0.70710677, %v1266_v30  ;;  %v195_v37 = vpop.f32.mrb[16].mxu0 }
 0x118   :  { %v347_v40 = vadd.f32 1.0, %v808_v3  ;;  %817 = verf.f32 %v288_v34  ;;  %v1272_v1 = vadd.f32 %v195_v37, %v1219_v44  ;;  %v197_v41 = vpop.f32.mrb[17].mxu0  ;;  %679 = vmatprep.mubr.msk.f32.mxu1 %vm433_vm0, %v377_v33 }
 0x119   :  { %819 = verf.f32 %v289_v36  ;;  %v1277_v46 = vadd.f32 %v197_v41, %v1221_v45  ;;  %562 = vmatmul.mubr.f32.gmra.mrb[2].mxu1 %v376_v38  ;;  %v378_v54 = vmul.f32 %v346_v35, %v250_v43  ;;  %v257_v38 = vmul.f32 0.5, %v1266_v30 }
 0x11a   :  { %v810_v48 = vpop.eup %809  ;;  %v379_v8 = vmul.f32 %v347_v40, %v251_v39  ;;  %v290_v49 = vmul.f32 0.70710677, %v1272_v1  ;;  %v256_v41 = vmul.f32 0.5, %v1261_v58 }
 0x11b   :  { %v812_v31 = vpop.eup %811  ;;  %v348_v50 = vadd.f32 1.0, %v810_v48  ;;  %v291_v51 = vmul.f32 0.70710677, %v1277_v46  ;;  %v201_v53 = vpop.f32.mrb[18].mxu0 }
 0x11c   :  { %v349_v56 = vadd.f32 1.0, %v812_v31  ;;  %821 = verf.f32 %v290_v49  ;;  %v1283_v28 = vadd.f32 %v201_v53, %v1219_v44  ;;  %v203_v52 = vpop.f32.mrb[19].mxu0  ;;  %680 = vmatprep.mubr.msk.f32.mxu1 %vm433_vm0, %v379_v8 }
 0x11d   :  { %823 = verf.f32 %v291_v51  ;;  %v1288_v61 = vadd.f32 %v203_v52, %v1221_v45  ;;  %567 = vmatmul.mubr.f32.gmra.mrb[4].mxu1 %v378_v54  ;;  %v380_v11 = vmul.f32 %v348_v50, %v252_v59  ;;  %v259_v54 = vmul.f32 0.5, %v1277_v46 }
 0x11e   :  { %v814_v63 = vpop.eup %813  ;;  %v381_v2 = vmul.f32 %v349_v56, %v253_v55  ;;  %v292_v5 = vmul.f32 0.70710677, %v1283_v28  ;;  %v258_v52 = vmul.f32 0.5, %v1272_v1 }
 0x11f   :  { %v816_v47 = vpop.eup %815  ;;  %v350_v6 = vadd.f32 1.0, %v814_v63  ;;  %v293_v60 = vmul.f32 0.70710677, %v1288_v61  ;;  %v207_v9 = vpop.f32.mrb[20].mxu0 }
 0x120   :  { %v351_v26 = vadd.f32 1.0, %v816_v47  ;;  %825 = verf.f32 %v292_v5  ;;  %v1294_v42 = vadd.f32 %v207_v9, %v1219_v44  ;;  %v209_v27 = vpop.f32.mrb[21].mxu0  ;;  %681 = vmatprep.mubr.msk.f32.mxu1 %vm433_vm0, %v381_v2 }
 0x121   :  { %827 = verf.f32 %v293_v60  ;;  %v1299_v29 = vadd.f32 %v209_v27, %v1221_v45  ;;  %572 = vmatmul.mubr.f32.gmra.mrb[6].mxu1 %v380_v11  ;;  %v382_v37 = vmul.f32 %v350_v6, %v254_v7  ;;  %v261_v11 = vmul.f32 0.5, %v1288_v61 }
 0x122   :  { %v818_v32 = vpop.eup %817  ;;  %v383_v33 = vmul.f32 %v351_v26, %v255_v25  ;;  %v294_v34 = vmul.f32 0.70710677, %v1294_v42  ;;  %v260_v27 = vmul.f32 0.5, %v1283_v28 }
 0x123   :  { %v820_v62 = vpop.eup %819  ;;  %v352_v3 = vadd.f32 1.0, %v818_v32  ;;  %v295_v35 = vmul.f32 0.70710677, %v1299_v29  ;;  %v213_v36 = vpop.f32.mrb[22].mxu0 }
 0x124   :  { %v353_v39 = vadd.f32 1.0, %v820_v62  ;;  %829 = verf.f32 %v294_v34  ;;  %v1305_v57 = vadd.f32 %v213_v36, %v1219_v44  ;;  %v215_v40 = vpop.f32.mrb[23].mxu0  ;;  %682 = vmatprep.mubr.msk.f32.mxu1 %vm433_vm0, %v383_v33 }
 0x125   :  { %831 = verf.f32 %v295_v35  ;;  %v1310_v43 = vadd.f32 %v215_v40, %v1221_v45  ;;  %577 = vmatmul.mubr.f32.gmra.mrb[8].mxu1 %v382_v37  ;;  %v384_v53 = vmul.f32 %v352_v3, %v256_v41  ;;  %v263_v37 = vmul.f32 0.5, %v1299_v29 }
 0x126   :  { %v822_v48 = vpop.eup %821  ;;  %v385_v8 = vmul.f32 %v353_v39, %v257_v38  ;;  %v296_v49 = vmul.f32 0.70710677, %v1305_v57  ;;  %v262_v40 = vmul.f32 0.5, %v1294_v42  ;;  %v264_v42 = vmul.f32 0.5, %v1305_v57 }
 0x127   :  { %v824_v30 = vpop.eup %823  ;;  %v354_v31 = vadd.f32 1.0, %v822_v48  ;;  %v297_v50 = vmul.f32 0.70710677, %v1310_v43  ;;  %v219_v51 = vpop.f32.mrb[24].mxu0 }
 0x128   :  { %v355_v55 = vadd.f32 1.0, %v824_v30  ;;  %833 = verf.f32 %v296_v49  ;;  %v1316_v58 = vadd.f32 %v219_v51, %v1219_v44  ;;  %v221_v56 = vpop.f32.mrb[25].mxu0  ;;  %683 = vmatprep.mubr.msk.f32.mxu1 %vm433_vm0, %v385_v8 }
 0x129   :  { %835 = verf.f32 %v297_v50  ;;  %v1321_v59 = vadd.f32 %v221_v56, %v1221_v45  ;;  %582 = vmatmul.mubr.f32.gmra.mrb[10].mxu1 %v384_v53  ;;  %v386_v9 = vmul.f32 %v354_v31, %v258_v52  ;;  %v265_v53 = vmul.f32 0.5, %v1310_v43 }
 0x12a   :  { %v826_v63 = vpop.eup %825  ;;  %v387_v2 = vmul.f32 %v355_v55, %v259_v54  ;;  %v298_v5 = vmul.f32 0.70710677, %v1316_v58 }
 0x12b   :  { %v828_v46 = vpop.eup %827  ;;  %v356_v47 = vadd.f32 1.0, %v826_v63  ;;  %v299_v6 = vmul.f32 0.70710677, %v1321_v59  ;;  %v225_v60 = vpop.f32.mrb[26].mxu0 }
 0x12c   :  { %v357_v25 = vadd.f32 1.0, %v828_v46  ;;  %837 = verf.f32 %v298_v5  ;;  %v1327_v1 = vadd.f32 %v225_v60, %v1219_v44  ;;  %v227_v26 = vpop.f32.mrb[27].mxu0  ;;  %684 = vmatprep.mubr.msk.f32.mxu1 %vm433_vm0, %v387_v2  ;;  %v267_v60 = vmul.f32 0.5, %v1321_v59 }
 0x12d   :  { %839 = verf.f32 %v299_v6  ;;  %v228_v7 = vadd.f32 %v227_v26, %v1221_v45  ;;  %587 = vmatmul.mubr.f32.gmra.mrb[12].mxu1 %v386_v9  ;;  %v388_v36 = vmul.f32 %v356_v47, %v260_v27 }
 0x12e   :  { %v830_v32 = vpop.eup %829  ;;  %v389_v33 = vmul.f32 %v357_v25, %v261_v11  ;;  %v300_v34 = vmul.f32 0.70710677, %v1327_v1 }
 0x12f   :  { %v832_v62 = vpop.eup %831  ;;  %v358_v61 = vadd.f32 1.0, %v830_v32  ;;  %v301_v3 = vmul.f32 0.70710677, %v228_v7  ;;  %v231_v35 = vpop.f32.mrb[28].mxu0  ;;  %v269_v27 = vmul.f32 0.5, %v228_v7 }
 0x130   :  { %v359_v38 = vadd.f32 1.0, %v832_v62  ;;  %841 = verf.f32 %v300_v34  ;;  %v232_v39 = vadd.f32 %v231_v35, %v1219_v44  ;;  %v233_v28 = vpop.f32.mrb[29].mxu0  ;;  %685 = vmatprep.mubr.msk.f32.mxu1 %vm433_vm0, %v389_v33  ;;  %v268_v33 = vmul.f32 0.5, %v1327_v1 }
 0x131   :  { %843 = verf.f32 %v301_v3  ;;  %v234_v41 = vadd.f32 %v233_v28, %v1221_v45  ;;  %592 = vmatmul.mubr.f32.gmra.mrb[14].mxu1 %v388_v36  ;;  %v390_v51 = vmul.f32 %v358_v61, %v262_v40 }
 0x132   :  { %v834_v48 = vpop.eup %833  ;;  %v391_v8 = vmul.f32 %v359_v38, %v263_v37  ;;  %v302_v49 = vmul.f32 0.70710677, %v232_v39  ;;  %v270_v36 = vmul.f32 0.5, %v232_v39  ;;  %v1354_v39 = vld [vmem:[%s1404_s4] ss:$0 sm:$0xff]  ;;  %s879_s4 = smov [#allocation2]  }
 0x133   :  { %v836_v30 = vpop.eup %835  ;;  %v360_v31 = vadd.f32 1.0, %v834_v48  ;;  %v303_v50 = vmul.f32 0.70710677, %v234_v41  ;;  %v237_v29 = vpop.f32.mrb[30].mxu0  ;;  %s664_s10 = sshll.u32 %s879_s4, 4  ;;  %s665_s10 = int_to_ptr.vmem [resolvable:$true] %s664_s10 }
 0x134   :  { %v361_v54 = vadd.f32 1.0, %v836_v30  ;;  %845 = verf.f32 %v302_v49  ;;  %v238_v55 = vadd.f32 %v237_v29, %v1219_v44  ;;  %v239_v56 = vpop.f32.mrb[31].mxu0  ;;  %686 = vmatprep.mubr.msk.f32.mxu1 %vm433_vm0, %v391_v8  ;;  %v266_v44 = vmul.f32 0.5, %v1316_v58  ;;  %s853_s11 = scalar_lea.vmem %s665_s10, 2048  ;;  %p858_p1 = scmp.lt.s32.totalorder %s665_s10, %s665_s10 }
 0x135   :  { %847 = verf.f32 %v303_v50  ;;  %v240_v52 = vadd.f32 %v239_v56, %v1221_v45  ;;  %597 = vmatmul.mubr.f32.gmra.mrb[16].mxu1 %v390_v51  ;;  %v392_v43 = vmul.f32 %v360_v31, %v264_v42  ;;  %v271_v58 = vmul.f32 0.5, %v234_v41  ;;  %p854_p0 = scmp.ne.s32.totalorder %s665_s10, %s853_s11  ;;  %p859_p2 = scmp.lt.s32.totalorder %s853_s11, %s853_s11 }
 0x136   :  { %v838_v63 = vpop.eup %837  ;;  %v393_v2 = vmul.f32 %v361_v54, %v265_v53  ;;  %v304_v5 = vmul.f32 0.70710677, %v238_v55  ;;  %v272_v1 = vmul.f32 0.5, %v238_v55 }
 0x137   :  { %v840_v46 = vpop.eup %839  ;;  %v362_v47 = vadd.f32 1.0, %v838_v63  ;;  %v305_v6 = vmul.f32 0.70710677, %v240_v52  ;;  %v273_v48 = vmul.f32 0.5, %v240_v52  ;;  %p860_p3 = por %p859_p2, %p858_p1 }
 0x138   :  { %v363_v9 = vadd.f32 1.0, %v840_v46  ;;  %849 = verf.f32 %v304_v5  ;;  %687 = vmatprep.mubr.msk.f32.mxu1 %vm433_vm0, %v393_v2 }
 0x139   :  { %851 = verf.f32 %v305_v6  ;;  %602 = vmatmul.mubr.f32.gmra.mrb[18].mxu1 %v392_v43  ;;  %v394_v26 = vmul.f32 %v362_v47, %v266_v44  ;;  %p861_p4 = pnand %p860_p3, %p854_p0 }
 0x13a   :  { %v842_v57 = vpop.eup %841  ;;  %v395_v45 = vmul.f32 %v363_v9, %v267_v60 }
 0x13b   :  { %v844_v11 = vpop.eup %843  ;;  %v364_v25 = vadd.f32 1.0, %v842_v57 }
 0x13c   :  { %v365_v32 = vadd.f32 1.0, %v844_v11  ;;  %688 = vmatprep.mubr.msk.f32.mxu1 %vm433_vm0, %v395_v45 }
 0x13d   :  { %607 = vmatmul.mubr.f32.gmra.mrb[20].mxu1 %v394_v26  ;;  %v396_v3 = vmul.f32 %v364_v25, %v268_v33 }
 0x13e   :  { %v846_v59 = vpop.eup %845  ;;  %v397_v34 = vmul.f32 %v365_v32, %v269_v27 }
 0x13f   :  { %v848_v62 = vpop.eup %847  ;;  %v366_v61 = vadd.f32 1.0, %v846_v59 }
 0x140   :  { %v367_v35 = vadd.f32 1.0, %v848_v62  ;;  %689 = vmatprep.mubr.msk.f32.mxu1 %vm433_vm0, %v397_v34 }
 0x141   :  { %612 = vmatmul.mubr.f32.gmra.mrb[22].mxu1 %v396_v3  ;;  %v398_v40 = vmul.f32 %v366_v61, %v270_v36 }
 0x142   :  { %v850_v37 = vpop.eup %849  ;;  %v399_v38 = vmul.f32 %v367_v35, %v271_v58 }
 0x143   :  { %v852_v7 = vpop.eup %851  ;;  %v368_v28 = vadd.f32 1.0, %v850_v37 }
 0x144   :  { %v369_v8 = vadd.f32 1.0, %v852_v7  ;;  %690 = vmatprep.mubr.msk.f32.mxu1 %vm433_vm0, %v399_v38 }
 0x145   :  { %617 = vmatmul.mubr.f32.gmra.mrb[24].mxu1 %v398_v40  ;;  %v400_v30 = vmul.f32 %v368_v28, %v272_v1 }
 0x146   :  { %v401_v49 = vmul.f32 %v369_v8, %v273_v48 }
 0x148   :  { %691 = vmatprep.mubr.msk.f32.mxu1 %vm433_vm0, %v401_v49 }
 0x149   :  { %622 = vmatmul.mubr.f32.gmra.mrb[26].mxu1 %v400_v30 }
 0x1e0   :  { %v548_v41 = vpop.f32.mrb[32].mxu0 }
 0x1e1   :  { %v549_v31 = vadd.f32 %v1354_v39, %v548_v41  ;;  %v550_v50 = vpop.f32.mrb[33].mxu0 }
 0x1e3   :  { %v627_v29 = vadd.f32 %v549_v31, %v1046_v0 }
 0x1e4   :  { %v553_v51 = vpop.f32.mrb[34].mxu0 }
 0x1e5   :  { %643 = vst [vmem:[#allocation2] sm:$0xff] %v627_v29  ;;  %v554_v53 = vadd.f32 %v1354_v39, %v553_v51  ;;  %v555_v54 = vpop.f32.mrb[35].mxu0 }
 0x1e7   :  { %v628_v55 = vadd.f32 %v554_v53, %v1061_v4 }
 0x1e8   :  { %v558_v56 = vpop.f32.mrb[0].mxu1 }
 0x1e9   :  { %644 = vst [vmem:[#allocation2 + $0x8] sm:$0xff] %v628_v55  ;;  %v559_v42 = vadd.f32 %v1354_v39, %v558_v56  ;;  %v560_v52 = vpop.f32.mrb[1].mxu1 }
 0x1eb   :  { %v629_v63 = vadd.f32 %v559_v42, %v1076_v10 }
 0x1ec   :  { %v563_v2 = vpop.f32.mrb[2].mxu1 }
 0x1ed   :  { %645 = vst [vmem:[#allocation2 + $0x10] sm:$0xff] %v629_v63  ;;  %v564_v5 = vadd.f32 %v1354_v39, %v563_v2  ;;  %v565_v46 = vpop.f32.mrb[3].mxu1 }
 0x1ef   :  { %v630_v0 = vadd.f32 %v564_v5, %v1085_v12 }
 0x1f0   :  { %v568_v47 = vpop.f32.mrb[4].mxu1 }
 0x1f1   :  { %646 = vst [vmem:[#allocation2 + $0x18] sm:$0xff] %v630_v0  ;;  %v569_v6 = vadd.f32 %v1354_v39, %v568_v47  ;;  %v570_v43 = vpop.f32.mrb[5].mxu1 }
 0x1f3   :  { %v631_v4 = vadd.f32 %v569_v6, %v1094_v13 }
 0x1f4   :  { %v573_v60 = vpop.f32.mrb[6].mxu1 }
 0x1f5   :  { %647 = vst [vmem:[#allocation2 + $0x20] sm:$0xff] %v631_v4  ;;  %v574_v9 = vadd.f32 %v1354_v39, %v573_v60  ;;  %v575_v44 = vpop.f32.mrb[7].mxu1 }
 0x1f7   :  { %v632_v10 = vadd.f32 %v574_v9, %v1102_v14 }
 0x1f8   :  { %v578_v57 = vpop.f32.mrb[8].mxu1 }
 0x1f9   :  { %648 = vst [vmem:[#allocation2 + $0x28] sm:$0xff] %v632_v10  ;;  %v579_v45 = vadd.f32 %v1354_v39, %v578_v57  ;;  %v580_v11 = vpop.f32.mrb[9].mxu1 }
 0x1fb   :  { %v633_v12 = vadd.f32 %v579_v45, %v1110_v15 }
 0x1fc   :  { %v583_v25 = vpop.f32.mrb[10].mxu1 }
 0x1fd   :  { %649 = vst [vmem:[#allocation2 + $0x30] sm:$0xff] %v633_v12  ;;  %v584_v26 = vadd.f32 %v1354_v39, %v583_v25  ;;  %v585_v27 = vpop.f32.mrb[11].mxu1 }
 0x1ff   :  { %v634_v13 = vadd.f32 %v584_v26, %v1118_v16 }
 0x200   :  { %v588_v32 = vpop.f32.mrb[12].mxu1 }
 0x201   :  { %650 = vst [vmem:[#allocation2 + $0x38] sm:$0xff] %v634_v13  ;;  %v589_v33 = vadd.f32 %v1354_v39, %v588_v32  ;;  %v590_v59 = vpop.f32.mrb[13].mxu1 }
 0x203   :  { %v635_v14 = vadd.f32 %v589_v33, %v1126_v17 }
 0x204   :  { %v593_v34 = vpop.f32.mrb[14].mxu1 }
 0x205   :  { %651 = vst [vmem:[#allocation2 + $0x40] sm:$0xff] %v635_v14  ;;  %v594_v62 = vadd.f32 %v1354_v39, %v593_v34  ;;  %v595_v61 = vpop.f32.mrb[15].mxu1 }
 0x207   :  { %v636_v15 = vadd.f32 %v594_v62, %v1133_v18 }
 0x208   :  { %v598_v3 = vpop.f32.mrb[16].mxu1 }
 0x209   :  { %652 = vst [vmem:[#allocation2 + $0x48] sm:$0xff] %v636_v15  ;;  %v599_v58 = vadd.f32 %v1354_v39, %v598_v3  ;;  %v600_v35 = vpop.f32.mrb[17].mxu1 }
 0x20b   :  { %v637_v16 = vadd.f32 %v599_v58, %v1140_v19 }
 0x20c   :  { %v603_v36 = vpop.f32.mrb[18].mxu1 }
 0x20d   :  { %653 = vst [vmem:[#allocation2 + $0x50] sm:$0xff] %v637_v16  ;;  %v604_v37 = vadd.f32 %v1354_v39, %v603_v36  ;;  %v605_v38 = vpop.f32.mrb[19].mxu1 }
 0x20f   :  { %v638_v17 = vadd.f32 %v604_v37, %v1147_v20 }
 0x210   :  { %v608_v7 = vpop.f32.mrb[20].mxu1 }
 0x211   :  { %654 = vst [vmem:[#allocation2 + $0x58] sm:$0xff] %v638_v17  ;;  %v609_v28 = vadd.f32 %v1354_v39, %v608_v7  ;;  %v610_v40 = vpop.f32.mrb[21].mxu1 }
 0x213   :  { %v639_v18 = vadd.f32 %v609_v28, %v1154_v21 }
 0x214   :  { %v613_v48 = vpop.f32.mrb[22].mxu1 }
 0x215   :  { %655 = vst [vmem:[#allocation2 + $0x60] sm:$0xff] %v639_v18  ;;  %v614_v8 = vadd.f32 %v1354_v39, %v613_v48  ;;  %v615_v1 = vpop.f32.mrb[23].mxu1 }
 0x217   :  { %v640_v19 = vadd.f32 %v614_v8, %v1161_v22 }
 0x218   :  { %v618_v49 = vpop.f32.mrb[24].mxu1 }
 0x219   :  { %656 = vst [vmem:[#allocation2 + $0x68] sm:$0xff] %v640_v19  ;;  %v619_v30 = vadd.f32 %v1354_v39, %v618_v49  ;;  %v620_v41 = vpop.f32.mrb[25].mxu1 }
 0x21b   :  { %v641_v20 = vadd.f32 %v619_v30, %v1168_v23 }
 0x21c   :  { %v623_v31 = vpop.f32.mrb[26].mxu1 }
 0x21d   :  { %657 = vst [vmem:[#allocation2 + $0x70] sm:$0xff] %v641_v20  ;;  %v624_v21 = vadd.f32 %v1354_v39, %v623_v31  ;;  %v625_v50 = vpop.f32.mrb[27].mxu1 }
 0x21f   :  { %v642_v29 = vadd.f32 %v624_v21, %v1175_v24 }
 0x221   :  { %658 = vst [vmem:[#allocation2 + $0x78] sm:$0xff] %v642_v29 }
 0x222   :  { %864 = shalt.err (!%p861_p4)
}
 0x223   :  { %s865_s14 = scalar_lea.hbm %s1405_s5, 2048 }
 0x224   :  { %p866_p5 = scmp.ne.s32.totalorder %s1405_s5, %s865_s14  ;;  %p869_p6 = scmp.lt.u32.totalorder %s865_s14, %s1405_s5 }
 0x226   :  { %p871_p7 = pnand %p869_p6, %p866_p5 }
 0x228   :  { %874 = shalt.err (!%p871_p7)
}
 0x229   :  { %s880_s19 = smov 128   ;;  %s881_s20 = smov 8  }
 0x22a   :  { %670 = dma.vmem_to_hbm [thread:$0]  %s665_s10, 2048, %s1405_s5, [#allocation3], %s880_s19, %s880_s19, %s881_s20  }
 0x22b   :  { %875 = dma.done.wait [#allocation3], 2048  }
 0x22c   :  { %876 = vsyncadd [#allocation3], 4294965248 }
 0x22d   :  { %674 = vsyncpa [#allocation3], 1 }

</bundles_post_ra>
